<compile_context>
chip_gen: v6e
topology: v6e:2x2x1
jax: 0.10.0
libtpu: 0.0.40
codegen_flags: <defaults>
</compile_context>

<pallas_src>
import jax
import jax.numpy as jnp
from jax.experimental import pallas as pl
from jax.experimental.pallas import tpu as pltpu


# ----------------------------- fused Pallas kernel ---------------------------

def _make_kernel(t_tile, B, C, C_out):
    """Build the fused kernel body for static (t_tile, B, C, C_out)."""
    CC = C * C

    def kernel(mu_ref, mu_seam_ref, w0_ref, w1_ref, bias_ref,
               cov_ref, cov_seam_ref, sc_ref, mu_out_ref, cov_out_ref):
        # mu_ref      : (tT, B*C)    native dtype, rows t .. t+tT-1 of stacked mu
        # mu_seam_ref : (8, B*C)     row 0 == mu[t + tT] (when needed)
        # w0_ref/w1_ref: (C, C_out)  taps 0 / 1 of the Conv1d weight (transposed)
        # bias_ref    : (1, C_out)
        # cov_ref     : (tT, B*C*C)  native dtype, rows t .. t+tT-1 of stacked cov
        # cov_seam_ref: (8, B*C*C)   row 0 == cov[t + tT] (when needed)
        # sc_ref      : SMEM (3,)    [w_cov_tap0, w_cov_tap1, b_cov]
        # mu_out_ref  : (B, tT, C_out)   batch-major output block
        # cov_out_ref : (B, tT, C*C)     batch-major output block
        f32 = jnp.float32

        # Hoist the SMEM scalars once.
        wc0 = sc_ref[0]
        wc1 = sc_ref[1]
        bcv = sc_ref[2]

        # ---------------- cov path: two-tap saxpy along time --------------------
        a = cov_ref[...].astype(f32)                       # a[r]   == cov[t + r]
        rot = pltpu.roll(a, shift=t_tile - 1, axis=0)      # rot[r] == a[(r + 1) % tT]
        bulk = wc0 * a + wc1 * rot + bcv                   # wrong only in the last row
        seam = cov_seam_ref[0:1, :].astype(f32)            # (1, F) == cov[t + tT]
        last = wc0 * a[t_tile - 1:t_tile, :] + wc1 * seam + bcv

        # ---------------- mu path: two-tap Conv1d on the MXU --------------------
        x = mu_ref[...].astype(f32)                        # (tT, B*C)
        xrot = pltpu.roll(x, shift=t_tile - 1, axis=0)     # x[(r + 1) % tT]
        xseam = mu_seam_ref[0:1, :].astype(f32)            # (1, B*C) == mu[t + tT]
        w0 = w0_ref[...]
        w1 = w1_ref[...]
        bias = bias_ref[...]                               # (1, C_out)

        # Per-batch lane-slice stores implement the (time-major -> batch-major)
        # transpose in VMEM, so the final HBM layout already matches PyTorch's
        # batch-major output and no extra XLA transpose pass is needed.
        # (B is assumed small; the loop is statically unrolled.)
        for b in range(B):
            cs = slice(b * CC, (b + 1) * CC)
            cov_out_ref[b, :, :] = bulk[:, cs]
            # Overwrite only the last row with the seam-corrected value
            # (cheaper than an iota/compare/select over the whole block).
            cov_out_ref[b, t_tile - 1:t_tile, :] = last[:, cs]

            ms = slice(b * C, (b + 1) * C)
            yb = (jnp.dot(x[:, ms], w0, preferred_element_type=f32)
                  + jnp.dot(xrot[:, ms], w1, preferred_element_type=f32)
                  + bias)
            mu_out_ref[b, :, :] = yb
            y_last = (jnp.dot(x[t_tile - 1:t_tile, ms], w0, preferred_element_type=f32)
                      + jnp.dot(xseam[:, ms], w1, preferred_element_type=f32)
                      + bias)
            mu_out_ref[b, t_tile - 1:t_tile, :] = y_last

    return kernel


# ----------------------------- tiling helpers ---------------------------------

def _chip_defaults():
    """Generation-aware tiling/VMEM defaults (safe fallback for unknown chips)."""
    kind = ""
    try:
        kind = jax.devices()[0].device_kind.lower()
    except Exception:  # pragma: no cover
        pass
    if ("v5" in kind) or ("v6" in kind):
        # 128 MiB physical VMEM: big double-buffered time tiles amortize per-step
        # overhead and push the mem-bound cov saxpy toward the HBM roofline.
        return dict(budget=48 << 20, limit=96 << 20, cap=1024, force_split=False)
    if ("v7" in kind) or ("7x" in kind):
        # 64 MiB VMEM; keep tiles modest but make sure there are >= 2 grid blocks so
        # the "parallel" axis can shard across both TensorCores.
        # TODO(synk): if plain "parallel" does not shard on v7x, add a leading size-2
        # CORE_PARALLEL grid axis and split the time range explicitly per core.
        return dict(budget=16 << 20, limit=32 << 20, cap=512, force_split=True)
    # Unknown chip: conservative limits that are legal everywhere.
    return dict(budget=12 << 20, limit=32 << 20, cap=512, force_split=True)


def _pick_time_tile(T_out, per_row_bytes, fixed_bytes, *, requested, budget, cap,
                    force_split):
    """Time tile: multiple of 8, sized against a (padding-aware) VMEM budget."""
    hard = max(8, ((T_out + 7) // 8) * 8)            # no point exceeding T_out
    if force_split and T_out >= 16:
        hard = min(hard, max(8, ((T_out // 2) // 8) * 8))   # guarantee >= 2 blocks
    if requested is not None:
        tile = max(8, (int(requested) // 8) * 8)
    else:
        avail = max(budget // 2 - fixed_bytes, 0)    # /2: double-buffered blocks
        tile = max(8, (avail // max(per_row_bytes, 1)) // 8 * 8)
        tile = min(tile, cap)
    return int(min(tile, hard))


# ----------------------------- wrapper ---------------------------------------

def causa_conv_forward(list_mu, list_cov, params, *, time_tile=None):
    """Mirrors CausaConv.forward.

    list_mu : (T, B, C)     == torch.stack(list_mu)
    list_cov: (T, B, C, C)  == torch.stack(list_cov)
    Returns (mu_n, cov_n) with PyTorch shapes (B, C, T-1) and (B, 1, T-1, C, C).
    """
    w_mu, b_mu, w_cov, b_cov = params
    T, B, C = list_mu.shape
    C_out = w_mu.shape[0]
    T_out = T - 1
    CC = C * C
    F = B * CC
    BC = B * C

    # Native-dtype, metadata-only reshapes: no wrapper-side astype / HBM pass.
    mu2d = list_mu.reshape(T, BC)
    cov2d = list_cov.reshape(T, F)

    # Tiny parameter prep.
    w0t = w_mu[:, :, 0].T.astype(jnp.float32)          # (C, C_out)
    w1t = w_mu[:, :, 1].T.astype(jnp.float32)          # (C, C_out)
    bias = b_mu.reshape(1, C_out).astype(jnp.float32)
    sc = jnp.stack([w_cov[0, 0, 0, 0, 0], w_cov[0, 0, 1, 0, 0],
                    b_cov[0]]).astype(jnp.float32)      # (3,) SMEM scalars

    cfg = _chip_defaults()
    cov_sz = jnp.dtype(list_cov.dtype).itemsize
    mu_sz = jnp.dtype(list_mu.dtype).itemsize
    rnd = lambda v: ((v + 127) // 128) * 128            # lane padding in VMEM
    per_row = (rnd(F) * cov_sz + rnd(BC) * mu_sz        # inputs (time-major, dense rows)
               + B * rnd(CC) * 4 + B * rnd(C_out) * 4)  # batch-major f32 output blocks
    fixed = 8 * (rnd(F) * cov_sz + rnd(BC) * mu_sz)     # 8-row seam blocks
    tT = _pick_time_tile(T_out, per_row, fixed, requested=time_tile,
                         budget=cfg["budget"], cap=cfg["cap"],
                         force_split=cfg["force_split"])
    # The seam logic below assumes 8-row-aligned seam blocks; keep this invariant.
    assert tT % 8 == 0, "time tile must be a multiple of 8 (seam blocks are 8 rows)"

    nt = pl.cdiv(T_out, tT)
    seam_step = tT // 8
    n_seam = pl.cdiv(T, 8)

    def seam_map(i):
        # Row 0 of this 8-row block is row (i+1)*tT.  It is only actually consumed
        # when (i+1)*tT <= T-1, in which case (i+1)*seam_step <= n_seam-1 and the
        # clamp never hides a genuinely needed row; when the last block is partial
        # the clamped (garbage) row feeds an output row that Pallas clips anyway.
        return (jnp.minimum((i + 1) * seam_step, n_seam - 1), 0)

    kernel = _make_kernel(tT, B, C, C_out)

    cost = pl.CostEstimate(
        flops=4 * T_out * B * C * C_out + 4 * T_out * F,
        transcendentals=0,
        bytes_accessed=(T * F * cov_sz + nt * 8 * F * cov_sz
                        + T * BC * mu_sz + nt * 8 * BC * mu_sz
                        + 4 * (T_out * F + T_out * B * C_out)
                        + 4 * (2 * C * C_out + C_out + 3)),
    )

    mu_btc, cov_btcc = pl.pallas_call(
        kernel,
        grid=(nt,),
        in_specs=[
            pl.BlockSpec((tT, BC), lambda i: (i, 0)),            # mu rows t..t+tT-1
            pl.BlockSpec((8, BC), seam_map),                     # mu seam row t+tT
            pl.BlockSpec((C, C_out), lambda i: (0, 0)),          # W_mu tap0 (transposed)
            pl.BlockSpec((C, C_out), lambda i: (0, 0)),          # W_mu tap1 (transposed)
            pl.BlockSpec((1, C_out), lambda i: (0, 0)),          # bias
            pl.BlockSpec((tT, F), lambda i: (i, 0)),             # cov rows t..t+tT-1
            pl.BlockSpec((8, F), seam_map),                      # cov seam row t+tT
            pl.BlockSpec(memory_space=pltpu.MemorySpace.SMEM),   # [w0, w1, b_cov]
        ],
        out_specs=(
            pl.BlockSpec((B, tT, C_out), lambda i: (0, i, 0)),   # mu out, batch-major
            pl.BlockSpec((B, tT, CC), lambda i: (0, i, 0)),      # cov out, batch-major
        ),
        out_shape=(
            jax.ShapeDtypeStruct((B, T_out, C_out), jnp.float32),
            jax.ShapeDtypeStruct((B, T_out, CC), jnp.float32),
        ),
        compiler_params=pltpu.CompilerParams(
            dimension_semantics=("parallel",),
            vmem_limit_bytes=cfg["limit"],
        ),
        cost_estimate=cost,
    )(mu2d, mu2d, w0t, w1t, bias, cov2d, cov2d, sc)

    # mu is the small tensor: only a minor-dim swap remains in XLA.
    mu_n = jnp.swapaxes(mu_btc, 1, 2)                     # (B, C_out, T-1)
    # cov already batch-major: pure (metadata) reshape, no data movement.
    cov_n = cov_btcc.reshape(B, 1, T_out, C, C)           # (B, 1, T-1, C, C)
    return mu_n, cov_n


# ----------------------------- reference (plain jnp) --------------------------

def causa_conv_reference(list_mu, list_cov, params):
    w_mu, b_mu, w_cov, b_cov = params
    mu = jnp.transpose(list_mu, (1, 2, 0)).astype(jnp.float32)                 # (B, C, T)
    cov = jnp.transpose(list_cov, (1, 0, 2, 3))[:, None].astype(jnp.float32)   # (B,1,T,C,C)
    B, C, T = mu.shape
    mu_n = (jnp.einsum("oc,bct->bot", w_mu[:, :, 0], mu[:, :, : T - 1])
            + jnp.einsum("oc,bct->bot", w_mu[:, :, 1], mu[:, :, 1:])
            + b_mu[None, :, None])
    cov_n = (w_cov[0, 0, 0, 0, 0] * cov[:, :, : T - 1]
             + w_cov[0, 0, 1, 0, 0] * cov[:, :, 1:]
             + b_cov[0])
    return mu_n, cov_n


# ----------------------------- main -------------------------------------------

if __name__ == "__main__":
    B = 2          # batch
    C = 8          # input_size (conv_mu channels; cov matrix dim)
    T = 20         # number of stacked time steps (len(list_mu))
    hidden_size = 32   # unused by forward (kept for parity with __init__ signature)
    n_layers = 1       # unused by forward

    key = jax.random.PRNGKey(0)
    k1, k2, k3, k4, k5, k6 = jax.random.split(key, 6)

    # Deterministic parameters (shapes match nn.Conv1d / nn.Conv3d).
    w_mu = jax.random.normal(k1, (C, C, 2), dtype=jnp.float32) * 0.1   # Conv1d weight
    b_mu = jax.random.normal(k2, (C,), dtype=jnp.float32) * 0.1        # Conv1d bias
    w_cov = jax.random.normal(k3, (1, 1, 2, 1, 1), dtype=jnp.float32)  # Conv3d weight
    b_cov = jax.random.normal(k4, (1,), dtype=jnp.float32)             # Conv3d bias
    params = (w_mu, b_mu, w_cov, b_cov)

    # "list_mu" / "list_cov" already stacked along the list (time) axis.
    list_mu = jax.random.normal(k5, (T, B, C), dtype=jnp.float32)
    list_cov = jax.random.normal(k6, (T, B, C, C), dtype=jnp.float32)

    fwd = jax.jit(causa_conv_forward, static_argnames=("time_tile",))

    # Auto-sized time tile ...
    mu_n, cov_n = jax.block_until_ready(fwd(list_mu, list_cov, params))
    # ... and an explicit small tile that exercises multi-block pipelining, the
    # cross-block seam fetch and the partial edge block.
    mu_n8, cov_n8 = jax.block_until_ready(fwd(list_mu, list_cov, params, time_tile=8))

    mu_ref, cov_ref = causa_conv_reference(list_mu, list_cov, params)
    assert mu_n.shape == (B, C, T - 1), mu_n.shape
    assert cov_n.shape == (B, 1, T - 1, C, C), cov_n.shape
    for got_mu, got_cov in ((mu_n, cov_n), (mu_n8, cov_n8)):
        assert jnp.allclose(got_mu, mu_ref, atol=1e-4, rtol=1e-4)
        assert jnp.allclose(got_cov, cov_ref, atol=1e-4, rtol=1e-4)

    print("KERNEL_OK")
</pallas_src>

<mosaic_0001>
module attributes {stable_mosaic.version = 11 : i64} {
  func.func @kernel(%arg0: i32, %arg1: memref<8x16xf32, #tpu.memory_space<vmem>>, %arg2: memref<8x16xf32, #tpu.memory_space<vmem>>, %arg3: memref<8x8xf32, #tpu.memory_space<vmem>>, %arg4: memref<8x8xf32, #tpu.memory_space<vmem>>, %arg5: memref<1x8xf32, #tpu.memory_space<vmem>>, %arg6: memref<8x128xf32, #tpu.memory_space<vmem>>, %arg7: memref<8x128xf32, #tpu.memory_space<vmem>>, %arg8: memref<3xf32, #tpu.memory_space<smem>>, %arg9: memref<2x8x8xf32, #tpu.memory_space<vmem>>, %arg10: memref<2x8x64xf32, #tpu.memory_space<vmem>>) attributes {dimension_semantics = [#tpu.dimension_semantics<parallel>], iteration_bounds = array<i64: 3>, scalar_prefetch = 0 : i64, scratch_operands = 0 : i64, tpu.core_type = #tpu.core_type<tc>, window_params = [{transform_indices = @transform_0, window_bounds = array<i64: 8, 16>}, {transform_indices = @transform_1, window_bounds = array<i64: 8, 16>}, {pipeline_mode = #tpu.pipeline_mode<synchronous>, transform_indices = @transform_2, window_bounds = array<i64: 8, 8>}, {pipeline_mode = #tpu.pipeline_mode<synchronous>, transform_indices = @transform_3, window_bounds = array<i64: 8, 8>}, {pipeline_mode = #tpu.pipeline_mode<synchronous>, transform_indices = @transform_4, window_bounds = array<i64: 1, 8>}, {transform_indices = @transform_5, window_bounds = array<i64: 8, 128>}, {transform_indices = @transform_6, window_bounds = array<i64: 8, 128>}, {transform_indices = @transform_7, window_bounds = array<i64: 3>}, {transform_indices = @transform_8, window_bounds = array<i64: 2, 8, 8>}, {transform_indices = @transform_9, window_bounds = array<i64: 2, 8, 64>}]} {
    %c0 = arith.constant 0 : index
    %0 = memref.load %arg8[%c0] : memref<3xf32, #tpu.memory_space<smem>>
    %c1 = arith.constant 1 : index
    %1 = memref.load %arg8[%c1] : memref<3xf32, #tpu.memory_space<smem>>
    %c2 = arith.constant 2 : index
    %2 = memref.load %arg8[%c2] : memref<3xf32, #tpu.memory_space<smem>>
    %c0_0 = arith.constant 0 : index
    %c0_1 = arith.constant 0 : index
    %3 = vector.load %arg6[%c0_0, %c0_1] : memref<8x128xf32, #tpu.memory_space<vmem>>, vector<8x128xf32>
    %c7_i32 = arith.constant 7 : i32
    %4 = tpu.dynamic_rotate %3 by %c7_i32 dim 0 : vector<8x128xf32>, i32 -> vector<8x128xf32>
    %5 = vector.broadcast %0 : f32 to vector<8x128xf32>
    %6 = arith.mulf %5, %3 : vector<8x128xf32>
    %7 = vector.broadcast %1 : f32 to vector<8x128xf32>
    %8 = arith.mulf %7, %4 : vector<8x128xf32>
    %9 = arith.addf %6, %8 : vector<8x128xf32>
    %10 = vector.broadcast %2 : f32 to vector<8x128xf32>
    %11 = arith.addf %9, %10 : vector<8x128xf32>
    %c0_2 = arith.constant 0 : index
    %c0_3 = arith.constant 0 : index
    %12 = vector.load %arg7[%c0_2, %c0_3] : memref<8x128xf32, #tpu.memory_space<vmem>>, vector<1x128xf32>
    %13 = vector.extract_strided_slice %3 {offsets = [7, 0], sizes = [1, 128], strides = [1, 1]} : vector<8x128xf32> to vector<1x128xf32>
    %14 = vector.broadcast %0 : f32 to vector<1x128xf32>
    %15 = arith.mulf %14, %13 : vector<1x128xf32>
    %16 = vector.broadcast %1 : f32 to vector<1x128xf32>
    %17 = arith.mulf %16, %12 : vector<1x128xf32>
    %18 = arith.addf %15, %17 : vector<1x128xf32>
    %19 = vector.broadcast %2 : f32 to vector<1x128xf32>
    %20 = arith.addf %18, %19 : vector<1x128xf32>
    %c0_4 = arith.constant 0 : index
    %c0_5 = arith.constant 0 : index
    %21 = vector.load %arg1[%c0_4, %c0_5] : memref<8x16xf32, #tpu.memory_space<vmem>>, vector<8x16xf32>
    %c7_i32_6 = arith.constant 7 : i32
    %22 = tpu.dynamic_rotate %21 by %c7_i32_6 dim 0 : vector<8x16xf32>, i32 -> vector<8x16xf32>
    %c0_7 = arith.constant 0 : index
    %c0_8 = arith.constant 0 : index
    %23 = vector.load %arg2[%c0_7, %c0_8] : memref<8x16xf32, #tpu.memory_space<vmem>>, vector<1x16xf32>
    %c0_9 = arith.constant 0 : index
    %c0_10 = arith.constant 0 : index
    %24 = vector.load %arg3[%c0_9, %c0_10] : memref<8x8xf32, #tpu.memory_space<vmem>>, vector<8x8xf32>
    %c0_11 = arith.constant 0 : index
    %c0_12 = arith.constant 0 : index
    %25 = vector.load %arg4[%c0_11, %c0_12] : memref<8x8xf32, #tpu.memory_space<vmem>>, vector<8x8xf32>
    %c0_13 = arith.constant 0 : index
    %c0_14 = arith.constant 0 : index
    %26 = vector.load %arg5[%c0_13, %c0_14] : memref<1x8xf32, #tpu.memory_space<vmem>>, vector<1x8xf32>
    %27 = vector.extract_strided_slice %11 {offsets = [0, 0], sizes = [8, 64], strides = [1, 1]} : vector<8x128xf32> to vector<8x64xf32>
    %c0_15 = arith.constant 0 : index
    %c0_16 = arith.constant 0 : index
    %c0_17 = arith.constant 0 : index
    %28 = vector.load %arg10[%c0_15, %c0_16, %c0_17] : memref<2x8x64xf32, #tpu.memory_space<vmem>>, vector<1x8x64xf32>
    %29 = vector.shape_cast %28 : vector<1x8x64xf32> to vector<8x64xf32>
    %30 = vector.shape_cast %27 : vector<8x64xf32> to vector<1x8x64xf32>
    tpu.vector_store %arg10[%c0_15, %c0_16, %c0_17], %30 {strides = array<i32>} : memref<2x8x64xf32, #tpu.memory_space<vmem>>, vector<1x8x64xf32>,
    %31 = vector.extract_strided_slice %20 {offsets = [0, 0], sizes = [1, 64], strides = [1, 1]} : vector<1x128xf32> to vector<1x64xf32>
    %c0_18 = arith.constant 0 : index
    %c7 = arith.constant 7 : index
    %c0_19 = arith.constant 0 : index
    %32 = vector.load %arg10[%c0_18, %c7, %c0_19] : memref<2x8x64xf32, #tpu.memory_space<vmem>>, vector<1x1x64xf32>
    %33 = vector.shape_cast %32 : vector<1x1x64xf32> to vector<1x64xf32>
    %34 = vector.shape_cast %31 : vector<1x64xf32> to vector<1x1x64xf32>
    tpu.vector_store %arg10[%c0_18, %c7, %c0_19], %34 {strides = array<i32>} : memref<2x8x64xf32, #tpu.memory_space<vmem>>, vector<1x1x64xf32>,
    %35 = vector.extract_strided_slice %21 {offsets = [0, 0], sizes = [8, 8], strides = [1, 1]} : vector<8x16xf32> to vector<8x8xf32>
    %cst = arith.constant dense<0.000000e+00> : vector<8x8xf32>
    %36 = tpu.matmul %35, %24, %cst {dimension_numbers = #tpu.dot_dimension_numbers<[1], [0], [0], [1], [0, 0, 1, 1], [], []>} : vector<8x8xf32>, vector<8x8xf32>, vector<8x8xf32> -> vector<8x8xf32>
    %37 = vector.extract_strided_slice %22 {offsets = [0, 0], sizes = [8, 8], strides = [1, 1]} : vector<8x16xf32> to vector<8x8xf32>
    %cst_20 = arith.constant dense<0.000000e+00> : vector<8x8xf32>
    %38 = tpu.matmul %37, %25, %cst_20 {dimension_numbers = #tpu.dot_dimension_numbers<[1], [0], [0], [1], [0, 0, 1, 1], [], []>} : vector<8x8xf32>, vector<8x8xf32>, vector<8x8xf32> -> vector<8x8xf32>
    %39 = arith.addf %36, %38 : vector<8x8xf32>
    %40 = vector.broadcast %26 : vector<1x8xf32> to vector<8x8xf32>
    %41 = arith.addf %39, %40 : vector<8x8xf32>
    %c0_21 = arith.constant 0 : index
    %c0_22 = arith.constant 0 : index
    %c0_23 = arith.constant 0 : index
    %42 = vector.load %arg9[%c0_21, %c0_22, %c0_23] : memref<2x8x8xf32, #tpu.memory_space<vmem>>, vector<1x8x8xf32>
    %43 = vector.shape_cast %42 : vector<1x8x8xf32> to vector<8x8xf32>
    %44 = vector.shape_cast %41 : vector<8x8xf32> to vector<1x8x8xf32>
    tpu.vector_store %arg9[%c0_21, %c0_22, %c0_23], %44 {strides = array<i32>} : memref<2x8x8xf32, #tpu.memory_space<vmem>>, vector<1x8x8xf32>,
    %45 = vector.extract_strided_slice %21 {offsets = [7, 0], sizes = [1, 8], strides = [1, 1]} : vector<8x16xf32> to vector<1x8xf32>
    %cst_24 = arith.constant dense<0.000000e+00> : vector<1x8xf32>
    %46 = tpu.matmul %45, %24, %cst_24 {dimension_numbers = #tpu.dot_dimension_numbers<[1], [0], [0], [1], [0, 0, 1, 1], [], []>} : vector<1x8xf32>, vector<8x8xf32>, vector<1x8xf32> -> vector<1x8xf32>
    %47 = vector.extract_strided_slice %23 {offsets = [0, 0], sizes = [1, 8], strides = [1, 1]} : vector<1x16xf32> to vector<1x8xf32>
    %cst_25 = arith.constant dense<0.000000e+00> : vector<1x8xf32>
    %48 = tpu.matmul %47, %25, %cst_25 {dimension_numbers = #tpu.dot_dimension_numbers<[1], [0], [0], [1], [0, 0, 1, 1], [], []>} : vector<1x8xf32>, vector<8x8xf32>, vector<1x8xf32> -> vector<1x8xf32>
    %49 = arith.addf %46, %48 : vector<1x8xf32>
    %50 = arith.addf %49, %26 : vector<1x8xf32>
    %c0_26 = arith.constant 0 : index
    %c7_27 = arith.constant 7 : index
    %c0_28 = arith.constant 0 : index
    %51 = vector.load %arg9[%c0_26, %c7_27, %c0_28] : memref<2x8x8xf32, #tpu.memory_space<vmem>>, vector<1x1x8xf32>
    %52 = vector.shape_cast %51 : vector<1x1x8xf32> to vector<1x8xf32>
    %53 = vector.shape_cast %50 : vector<1x8xf32> to vector<1x1x8xf32>
    tpu.vector_store %arg9[%c0_26, %c7_27, %c0_28], %53 {strides = array<i32>} : memref<2x8x8xf32, #tpu.memory_space<vmem>>, vector<1x1x8xf32>,
    %54 = vector.extract_strided_slice %11 {offsets = [0, 64], sizes = [8, 64], strides = [1, 1]} : vector<8x128xf32> to vector<8x64xf32>
    %c1_29 = arith.constant 1 : index
    %c0_30 = arith.constant 0 : index
    %c0_31 = arith.constant 0 : index
    %55 = vector.load %arg10[%c1_29, %c0_30, %c0_31] : memref<2x8x64xf32, #tpu.memory_space<vmem>>, vector<1x8x64xf32>
    %56 = vector.shape_cast %55 : vector<1x8x64xf32> to vector<8x64xf32>
    %57 = vector.shape_cast %54 : vector<8x64xf32> to vector<1x8x64xf32>
    tpu.vector_store %arg10[%c1_29, %c0_30, %c0_31], %57 {strides = array<i32>} : memref<2x8x64xf32, #tpu.memory_space<vmem>>, vector<1x8x64xf32>,
    %58 = vector.extract_strided_slice %20 {offsets = [0, 64], sizes = [1, 64], strides = [1, 1]} : vector<1x128xf32> to vector<1x64xf32>
    %c1_32 = arith.constant 1 : index
    %c7_33 = arith.constant 7 : index
    %c0_34 = arith.constant 0 : index
    %59 = vector.load %arg10[%c1_32, %c7_33, %c0_34] : memref<2x8x64xf32, #tpu.memory_space<vmem>>, vector<1x1x64xf32>
    %60 = vector.shape_cast %59 : vector<1x1x64xf32> to vector<1x64xf32>
    %61 = vector.shape_cast %58 : vector<1x64xf32> to vector<1x1x64xf32>
    tpu.vector_store %arg10[%c1_32, %c7_33, %c0_34], %61 {strides = array<i32>} : memref<2x8x64xf32, #tpu.memory_space<vmem>>, vector<1x1x64xf32>,
    %62 = vector.extract_strided_slice %21 {offsets = [0, 8], sizes = [8, 8], strides = [1, 1]} : vector<8x16xf32> to vector<8x8xf32>
    %cst_35 = arith.constant dense<0.000000e+00> : vector<8x8xf32>
    %63 = tpu.matmul %62, %24, %cst_35 {dimension_numbers = #tpu.dot_dimension_numbers<[1], [0], [0], [1], [0, 0, 1, 1], [], []>} : vector<8x8xf32>, vector<8x8xf32>, vector<8x8xf32> -> vector<8x8xf32>
    %64 = vector.extract_strided_slice %22 {offsets = [0, 8], sizes = [8, 8], strides = [1, 1]} : vector<8x16xf32> to vector<8x8xf32>
    %cst_36 = arith.constant dense<0.000000e+00> : vector<8x8xf32>
    %65 = tpu.matmul %64, %25, %cst_36 {dimension_numbers = #tpu.dot_dimension_numbers<[1], [0], [0], [1], [0, 0, 1, 1], [], []>} : vector<8x8xf32>, vector<8x8xf32>, vector<8x8xf32> -> vector<8x8xf32>
    %66 = arith.addf %63, %65 : vector<8x8xf32>
    %67 = vector.broadcast %26 : vector<1x8xf32> to vector<8x8xf32>
    %68 = arith.addf %66, %67 : vector<8x8xf32>
    %c1_37 = arith.constant 1 : index
    %c0_38 = arith.constant 0 : index
    %c0_39 = arith.constant 0 : index
    %69 = vector.load %arg9[%c1_37, %c0_38, %c0_39] : memref<2x8x8xf32, #tpu.memory_space<vmem>>, vector<1x8x8xf32>
    %70 = vector.shape_cast %69 : vector<1x8x8xf32> to vector<8x8xf32>
    %71 = vector.shape_cast %68 : vector<8x8xf32> to vector<1x8x8xf32>
    tpu.vector_store %arg9[%c1_37, %c0_38, %c0_39], %71 {strides = array<i32>} : memref<2x8x8xf32, #tpu.memory_space<vmem>>, vector<1x8x8xf32>,
    %72 = vector.extract_strided_slice %21 {offsets = [7, 8], sizes = [1, 8], strides = [1, 1]} : vector<8x16xf32> to vector<1x8xf32>
    %cst_40 = arith.constant dense<0.000000e+00> : vector<1x8xf32>
    %73 = tpu.matmul %72, %24, %cst_40 {dimension_numbers = #tpu.dot_dimension_numbers<[1], [0], [0], [1], [0, 0, 1, 1], [], []>} : vector<1x8xf32>, vector<8x8xf32>, vector<1x8xf32> -> vector<1x8xf32>
    %74 = vector.extract_strided_slice %23 {offsets = [0, 8], sizes = [1, 8], strides = [1, 1]} : vector<1x16xf32> to vector<1x8xf32>
    %cst_41 = arith.constant dense<0.000000e+00> : vector<1x8xf32>
    %75 = tpu.matmul %74, %25, %cst_41 {dimension_numbers = #tpu.dot_dimension_numbers<[1], [0], [0], [1], [0, 0, 1, 1], [], []>} : vector<1x8xf32>, vector<8x8xf32>, vector<1x8xf32> -> vector<1x8xf32>
    %76 = arith.addf %73, %75 : vector<1x8xf32>
    %77 = arith.addf %76, %26 : vector<1x8xf32>
    %c1_42 = arith.constant 1 : index
    %c7_43 = arith.constant 7 : index
    %c0_44 = arith.constant 0 : index
    %78 = vector.load %arg9[%c1_42, %c7_43, %c0_44] : memref<2x8x8xf32, #tpu.memory_space<vmem>>, vector<1x1x8xf32>
    %79 = vector.shape_cast %78 : vector<1x1x8xf32> to vector<1x8xf32>
    %80 = vector.shape_cast %77 : vector<1x8xf32> to vector<1x1x8xf32>
    tpu.vector_store %arg9[%c1_42, %c7_43, %c0_44], %80 {strides = array<i32>} : memref<2x8x8xf32, #tpu.memory_space<vmem>>, vector<1x1x8xf32>,
    return
  }
  func.func @transform_0(%arg0: i32) -> (i32, i32) {
    %c0_i32 = arith.constant 0 : i32
    %c0_i32_0 = arith.constant 0 : i32
    return %arg0, %c0_i32 : i32, i32
  }
  func.func @transform_1(%arg0: i32) -> (i32, i32) {
    %c1_i32 = arith.constant 1 : i32
    %0 = arith.addi %arg0, %c1_i32 : i32
    %c1_i32_0 = arith.constant 1 : i32
    %1 = arith.muli %0, %c1_i32_0 : i32
    %c2_i32 = arith.constant 2 : i32
    %2 = arith.minsi %1, %c2_i32 : i32
    %c0_i32 = arith.constant 0 : i32
    %c0_i32_1 = arith.constant 0 : i32
    return %2, %c0_i32 : i32, i32
  }
  func.func @transform_2(%arg0: i32) -> (i32, i32) {
    %c0_i32 = arith.constant 0 : i32
    %c0_i32_0 = arith.constant 0 : i32
    %c0_i32_1 = arith.constant 0 : i32
    return %c0_i32, %c0_i32_0 : i32, i32
  }
  func.func @transform_3(%arg0: i32) -> (i32, i32) {
    %c0_i32 = arith.constant 0 : i32
    %c0_i32_0 = arith.constant 0 : i32
    %c0_i32_1 = arith.constant 0 : i32
    return %c0_i32, %c0_i32_0 : i32, i32
  }
  func.func @transform_4(%arg0: i32) -> (i32, i32) {
    %c0_i32 = arith.constant 0 : i32
    %c0_i32_0 = arith.constant 0 : i32
    %c0_i32_1 = arith.constant 0 : i32
    return %c0_i32, %c0_i32_0 : i32, i32
  }
  func.func @transform_5(%arg0: i32) -> (i32, i32) {
    %c0_i32 = arith.constant 0 : i32
    %c0_i32_0 = arith.constant 0 : i32
    return %arg0, %c0_i32 : i32, i32
  }
  func.func @transform_6(%arg0: i32) -> (i32, i32) {
    %c1_i32 = arith.constant 1 : i32
    %0 = arith.addi %arg0, %c1_i32 : i32
    %c1_i32_0 = arith.constant 1 : i32
    %1 = arith.muli %0, %c1_i32_0 : i32
    %c2_i32 = arith.constant 2 : i32
    %2 = arith.minsi %1, %c2_i32 : i32
    %c0_i32 = arith.constant 0 : i32
    %c0_i32_1 = arith.constant 0 : i32
    return %2, %c0_i32 : i32, i32
  }
  func.func @transform_7(%arg0: i32) -> i32 {
    %c0_i32 = arith.constant 0 : i32
    %c0_i32_0 = arith.constant 0 : i32
    return %c0_i32 : i32
  }
  func.func @transform_8(%arg0: i32) -> (i32, i32, i32) {
    %c0_i32 = arith.constant 0 : i32
    %c0_i32_0 = arith.constant 0 : i32
    %c0_i32_1 = arith.constant 0 : i32
    return %c0_i32, %arg0, %c0_i32_0 : i32, i32, i32
  }
  func.func @transform_9(%arg0: i32) -> (i32, i32, i32) {
    %c0_i32 = arith.constant 0 : i32
    %c0_i32_0 = arith.constant 0 : i32
    %c0_i32_1 = arith.constant 0 : i32
    return %c0_i32, %arg0, %c0_i32_0 : i32, i32, i32
  }
}

</mosaic_0001>

<bundles_post_ra>
// kernel: causa_conv_forward.1
= control target key start
LH: loop header
LB: loop body
LE: loop exit
PB: predicated region body
PF: predicated region fallthrough
CT: control target
= control target key end

     0   :  { %15 = vsyncpa [#allocation3], 0  ;;  %s1533_s30 = smov 0   ;;  %s1535_s10 = smov 0   ;;  %s1701_s0 = inlined_call_operand.vmem [shape: f32[20,16], index: 0, kind: input, shape index: {}, may-alias: {0,1}]   ;;  %s1702_s1 = inlined_call_operand.vmem [shape: f32[20,16], index: 1, kind: input, shape index: {}, may-alias: {0,1}]   ;;  %s1703_s2 = inlined_call_operand.vmem [shape: f32[8,8], index: 2, kind: input, shape index: {}]   ;;  %s1704_s3 = inlined_call_operand.vmem [shape: f32[8,8], index: 3, kind: input, shape index: {}]   ;;  %s1705_s4 = inlined_call_operand.vmem [shape: f32[1,8], index: 4, kind: input, shape index: {}]   ;;  %s1706_s5 = inlined_call_operand.vmem [shape: f32[20,128], index: 5, kind: input, shape index: {}, may-alias: {5,6}]   ;;  %s1707_s6 = inlined_call_operand.vmem [shape: f32[20,128], index: 6, kind: input, shape index: {}, may-alias: {5,6}]   ;;  %s1708_s7 = inlined_call_operand.vmem [shape: f32[3], index: 7, kind: input, shape index: {}]   ;;  %s1709_s8 = inlined_call_operand.vmem [shape: f32[2,19,8], index: 8, kind: output, shape index: {0}]   ;;  %s1710_s9 = inlined_call_operand.vmem [shape: f32[2,19,64], index: 9, kind: output, shape index: {1}]  }
   0x1   :  { %s1537_s11 = smov 0  }
   0x2 LB: > { %s1546_s12 = sadd.s32 4294967295, %s1476_s11   ;;  %s1548_s13 = sadd.s32 1, %s1476_s11   ;;  %s1476_s11 = sphi %s1537_s11, %s1716_s11   ;;  %s1472_s10 = sphi %s1535_s10, %s1715_s10   ;;  %s1468_s30 = sphi %s1533_s30, %s1714_s30  }
   0x3   : > { %s225_s14 = ssub.s32 %s1476_s11, %s1548_s13  ;;  %s228_s15 = sadd.s32 1, %s1472_s10 }
   0x4   : > { %p226_p0 = scmp.eq.s32.totalorder %s225_s14, 0  ;;  %p238_p1 = scmp.ne.s32.totalorder %s1472_s10, %s1468_s30 }
   0x5   : > { %p239_p2 = scmp.eq.s32.totalorder %s1546_s12, 2  ;;  %p1303_p3 = scmp.ge.s32.totalorder %s1476_s11, 1 }
   0x6   : > { %s1556_s16 = scalar_select %p226_p0, %s1472_s10, %s228_s15  }
   0x7   : > { %p1558_p4 = por %p239_p2, %p238_p1  ;;  %p278_p5 = scmp.lt.s32.totalorder %s1476_s11, 4 }
   0x8   : > { %p1404_p6 = scmp.eq.s32.totalorder %s1546_s12, 0  ;;  %s300_s21 = sshll.u32 %s1708_s7, 4  ;;  %s301_s21 = int_to_ptr.vmem [resolvable:$true] %s300_s21 }
   0x9   : > { %p1563_p7 = pnand %p1303_p3, %p278_p5  ;;  %s1435_s22 = scalar_lea.vmem %s301_s21, 16 }
   0xa   : > { %p1436_p10 = scmp.ne.s32.totalorder %s301_s21, %s1435_s22  ;;  %p1443_p0 = scmp.lt.s32.totalorder %s301_s21, %s301_s21 }
   0xb   : > { %p1400_p8 = pneg %p1563_p7  ;;  %p1444_p1 = scmp.lt.s32.totalorder %s1435_s22, %s1435_s22 }
   0xd   : > { %p1401_p9 = pnand %p1404_p6, %p1400_p8  ;;  %p1445_p2 = por %p1444_p1, %p1443_p0 }
   0xf   : > { %p1437_p11 = pneg %p1401_p9 }
  0x11   : > { %p1438_p12 = pnand %p1437_p11, %p1436_p10 }
  0x13   : > { %p1439_p13 = pneg %p1438_p12 }
  0x15   : > { %p1446_p3 = pnand %p1445_p2, %p1439_p13 }
  0x17   : > { %1449 = shalt.err (!%p1446_p3)
}
  0x18   : > { %s1478_s23 = smov [#allocation2]   ;;  %353 = sbr.rel (%p1563_p7) target bundleno = 376 (0x178), region = 52 }
  0x19   : > { %1403 = dma.vmem_to_smem (!%p1401_p9), %s301_s21, 16, %s1478_s23, [#allocation3]  }
  0x1d   : > { %1463 = dma.done.wait (%p1404_p6), [#allocation3], 16  }
  0x1e   : > { %1465 = vsyncadd (%p1404_p6), [#allocation3], 4294967280 }
  0x1f   : > { %359 = sfence }
  0x20   : > { %p410_p5 = scmp.lt.s32.totalorder %s1546_s12, 2  ;;  %v1584_v0 = vld [vmem:[%s1704_s3] sm:$0xff]  ;;  %s414_s26 = sadd.s32 1, %s1546_s12  ;;  %v1479_v1 = vmov 0.0   ;;  %vm1480_vm0 = vmmov 0   ;;  %vm467_vm1 = vcmask 64512   ;;  %v615_v25 = vlaneseq }
  0x21   : > { %s1587_s27 = sld [smem:[#allocation2 + $0x1]]  ;;  %1356 = vmatprep.subr.mxu0 %v1479_v1  ;;  %1358 = vmatprep.mubr.msk.f32.mxu0 %vm1480_vm0, %v1479_v1  ;;  %v1595_v2 = vld [vmem:[%s1703_s2] sm:$0xff]  ;;  %p1600_p6 = scmp.lt.s32.totalorder %s414_s26, 2  ;;  %vm463_vm2 = vcmask 523264   ;;  %vm465_vm3 = vcmask 523271   ;;  %vm769_vm4 = vcmask 57344  }
  0x22   : > { %s411_s11 = scalar_select %p410_p5, %s1546_s12, 2  ;;  %1357 = vmatpush3.msra.mxu0 %v1584_v0  ;;  %1361 = vmatprep.subr.mxu1 %v1479_v1  ;;  %v616_v26 = vshrl.u32 %v615_v25, 7  ;;  %v462_v28 = vld [vmem:[%s1705_s4] sm:$0x1] }
  0x23   : > { %1362 = vmatpush3.msra.mxu1 %v1595_v2  ;;  %1363 = vmatprep.mubr.msk.f32.mxu1 %vm1480_vm0, %v1479_v1  ;;  %s438_s18 = sld [smem:[#allocation2]]  ;;  %s1718_s26 = smov (!%p1600_p6, %s414_s26), 2 }
  0x24   : > { %s1310_s15 = sshll.u32 %s411_s11, 3  ;;  %1366 = vmatprep.subr.mxu0 %v1479_v1  ;;  %1371 = vmatprep.subr.mxu1 %v1479_v1  ;;  %s1619_s25 = sld [smem:[#allocation2 + $0x2]]  ;;  %v617_v27 = vsub.s32 0, %v616_v26 }
  0x25   : > { %s413_s21 = scalar_lea.vmem %s1701_s0, %s1310_s15  ;;  %s427_s24 = scalar_lea.vmem %s1706_s5, %s1310_s15 }
  0x26   : > { %v441_v3 = vld [vmem:[%s427_s24] sm:$0xff]  ;;  %s1720_s26 = smov (!%p1600_p6, %s1718_s26), 2  ;;  %s1481_s28 = smov 120   ;;  %v618_v31 = vrot.slane %v462_v28, %v617_v27 }
  0x27   : > { %v457_v4 = vld [vmem:[%s413_s21] sm:$0xff]  ;;  %v445_v6 = vstv %s1587_s27  ;;  %v442_v7 = vrot.slane %v441_v3, 1  ;;  %s1314_s27 = sshll.u32 %s1720_s26, 3  ;;  %s1482_s26 = smov 64  }
  0x28   : > { %v458_v5 = vrot.slane %v457_v4, 1  ;;  %1364 = vmatmul.mubr.msk.f32.vlgmr.msra.gmra.mxu1 %vm467_vm1, %v457_v4  ;;  %v695_v9 = vrot.slane %v457_v4, 7  ;;  %s420_s14 = scalar_lea.vmem %s1702_s1, %s1314_s27  ;;  %s434_s20 = scalar_lea.vmem %s1707_s6, %s1314_s27 }
  0x29   : > { %1372 = vmatpush3.msra.mxu1 %v1595_v2  ;;  %1373 = vmatprep.mubr.msk.f32.mxu1 %vm1480_vm0, %v1479_v1  ;;  %v446_v8 = vmul.f32 %v445_v6, %v442_v7  ;;  %v443_v10 = vstv %s438_s18  ;;  %v450_v12 = vld [vmem:[%s434_s20] sm:$0x1]  ;;  %s401_s18 = sand.u32 1, %s1468_s30  }
  0x2a   : > { %782 = vrot.lane.b32.xlu0 %v458_v5, %s1481_s28  ;;  %1359 = vmatmul.mubr.msk.f32.vlgmr.msra.gmra.mxu0 %vm467_vm1, %v458_v5  ;;  %v444_v11 = vmul.f32 %v443_v10, %v441_v3  ;;  %v459_v13 = vld [vmem:[%s420_s14] sm:$0x1]  ;;  %v451_v14 = vmul.f32 %v450_v12, %v445_v6  ;;  %v448_v16 = vstv %s1619_s25  ;;  %s1308_s23 = sshll.u32 %s401_s18, 4  ;;  %s1336_s25 = sshll.u32 (%p1558_p4), %s1546_s12, 3 }
  0x2b   : > { %1367 = vmatpush3.msra.mxu0 %v1584_v0  ;;  %1368 = vmatprep.mubr.msk.f32.mxu0 %vm1480_vm0, %v1479_v1  ;;  %s1667_s24 = scalar_lea.vmem [#allocation5], %s1308_s23  ;;  %s403_s30 = scalar_lea.vmem [#allocation4], %s1308_s23 }
  0x2c   : > { %1374 = vmatmul.mubr.msk.f32.vlgmr.msra.gmra.mxu1 %vm467_vm1, %v695_v9  ;;  %1376 = vmatprep.subr.mxu0 %v1479_v1  ;;  %v447_v15 = vadd.f32 %v446_v8, %v444_v11  ;;  %v453_v17 = vrot.slane %v451_v14, 1  ;;  %s1095_s29 = scalar_lea.vmem (%p1558_p4), %s1709_s8, %s1336_s25 }
  0x2d   : > { %1381 = vmatprep.subr.mxu1 %v1479_v1  ;;  %1383 = vmatprep.mubr.msk.f32.mxu1 %vm1480_vm0, %v1479_v1 }
  0x2e   : > { %933 = vrot.lane.b32.xlu1 %v459_v13, %s1481_s28  ;;  %856 = vrot.lane.b32.xlu0 %v457_v4, %s1481_s28  ;;  %v449_v18 = vadd.f32 %v448_v16, %v447_v15  ;;  %v455_v19 = vadd.f32 %v453_v17, %v444_v11 }
  0x2f   : > { %1369 = vmatmul.mubr.msk.f32.vlgmr.msra.gmra.mxu0 %vm467_vm1, %v459_v13  ;;  %1382 = vmatpush3.msra.mxu1 %v1595_v2 }
  0x30   : > { %1377 = vmatpush3.msra.mxu0 %v1584_v0  ;;  %1378 = vmatprep.mubr.msk.f32.mxu0 %vm1480_vm0, %v1479_v1  ;;  %v456_v20 = vadd.f32 %v455_v19, %v448_v16  ;;  %464 = vst.msk [vmem:[%s1667_s24] sm:$0xff] %vm463_vm2, %v449_v18 }
  0x31   : > { %1386 = vmatprep.subr.mxu0 %v1479_v1  ;;  %1391 = vmatprep.subr.mxu1 %v1479_v1 }
  0x32   : > { %1007 = vrot.lane.b32.xlu1 %v695_v9, %s1481_s28  ;;  %772 = vrot.lane.b32.xlu0 %v449_v18, %s1482_s26  ;;  %466 = vst.msk [vmem:[%s1667_s24] sm:$0x80] %vm465_vm3, %v456_v20 }
  0x36   : > { %778 = vrot.lane.b32.xlu1 %v456_v20, %s1482_s26 }
  0x9c   : > { %v783_v21 = vpop.permute.xlu0 %782 }
  0x9d   : > { %1379 = vmatmul.mubr.msk.f32.vlgmr.msra.gmra.mxu0 %vm467_vm1, %v783_v21 }
  0x9e   : > { %1387 = vmatpush3.msra.mxu0 %v1584_v0  ;;  %1388 = vmatprep.mubr.msk.f32.mxu0 %vm1480_vm0, %v1479_v1 }
  0xa0   : > { %v934_v22 = vpop.permute.xlu1 %933  ;;  %v857_v23 = vpop.permute.xlu0 %856 }
  0xa1   : > { %1384 = vmatmul.mubr.msk.f32.vlgmr.msra.gmra.mxu1 %vm467_vm1, %v857_v23  ;;  %1389 = vmatmul.mubr.msk.f32.vlgmr.msra.gmra.mxu0 %vm467_vm1, %v934_v22 }
  0xa2   : > { %1392 = vmatpush3.msra.mxu1 %v1595_v2  ;;  %1393 = vmatprep.mubr.msk.f32.mxu1 %vm1480_vm0, %v1479_v1 }
  0xa4   : > { %v1008_v24 = vpop.permute.xlu1 %1007  ;;  %v773_v30 = vpop.permute.xlu0 %772 }
  0xa5   : > { %1394 = vmatmul.mubr.msk.f32.vlgmr.msra.gmra.mxu1 %vm467_vm1, %v1008_v24  ;;  %1326 = vst.msk [vmem:[%s1667_s24 + $0x8] sm:$0xff] %vm463_vm2, %v773_v30 }
  0xa8   : > { %v779_v32 = vpop.permute.xlu1 %778 }
  0xa9   : > { %1327 = vst.msk [vmem:[%s1667_s24 + $0x8] sm:$0x80] %vm465_vm3, %v779_v32 }
  0xe8   : > { %v610_v29 = vpop.f32.mrf.mxu1 }
  0xea   : > { %v537_v33 = vpop.f32.mrf.mxu0  ;;  %v1365_v34 = vpop.f32.mrf.mxu1 }
  0xeb   : > { %v611_v35 = vadd.f32 %v610_v29, %v537_v33 }
  0xec   : > { %v1360_v36 = vpop.f32.mrf.mxu0  ;;  %v764_v37 = vpop.f32.mrf.mxu1 }
  0xed   : > { %v620_v38 = vadd.f32 %v618_v31, %v611_v35 }
  0xee   : > { %v1375_v39 = vpop.f32.mrf.mxu1 }
  0xef   : > { %v691_v40 = vpop.f32.mrf.mxu0  ;;  %621 = vst.msk [vmem:[%s403_s30] sm:$0xff] %vm467_vm1, %v620_v38 }
  0xf0   : > { %v765_v41 = vadd.f32 %v764_v37, %v691_v40 }
  0xf1   : > { %v1370_v42 = vpop.f32.mrf.mxu0 }
  0xf2   : > { %v768_v43 = vadd.f32 %v765_v41, %v462_v28 }
  0xf4   : > { %770 = vst.msk [vmem:[%s403_s30 + $0x7] sm:$0x1] %vm769_vm4, %v768_v43 }
  0xfb   : > { %v1126_v56 = vld [vmem:[%s403_s30] sm:$0xff] (%p1558_p4) }
  0xfc   : > { %1127 = vst [vmem:[%s1095_s29] sm:$0xff] (%p1558_p4), %v1126_v56 }
 0x15d   : > { %v852_v44 = vpop.f32.mrf.mxu0 }
 0x15f   : > { %v1380_v45 = vpop.f32.mrf.mxu0 }
 0x161   : > { %v926_v46 = vpop.f32.mrf.mxu1  ;;  %v1003_v47 = vpop.f32.mrf.mxu0 }
 0x162   : > { %v927_v48 = vadd.f32 %v926_v46, %v852_v44 }
 0x163   : > { %v1385_v49 = vpop.f32.mrf.mxu1  ;;  %v1390_v50 = vpop.f32.mrf.mxu0 }
 0x164   : > { %v930_v51 = vadd.f32 %v927_v48, %v618_v31 }
 0x165   : > { %v1077_v52 = vpop.f32.mrf.mxu1 }
 0x166   : > { %v1078_v53 = vadd.f32 %v1077_v52, %v1003_v47  ;;  %1330 = vst.msk [vmem:[%s403_s30 + $0x8] sm:$0xff] %vm467_vm1, %v930_v51  ;;  %1093 = sbr.rel (!%p1558_p4) target bundleno = 371 (0x173), region = 60 }
 0x167   : > { %v1395_v54 = vpop.f32.mrf.mxu1 }
 0x168   : > { %v1081_v55 = vadd.f32 %v1078_v53, %v462_v28 }
 0x16a   : > { %1333 = vst.msk [vmem:[%s403_s30 + $0xf] sm:$0x1] %vm769_vm4, %v1081_v55 }
 0x171   : > { %v1128_v57 = vld [vmem:[%s403_s30 + $0x8] sm:$0xff] }
 0x172   : > { %1129 = vst [vmem:[%s1095_s29 + $0x18] sm:$0xff] %v1128_v57 }
 0x173 PF: > { %1135 = sbr.rel (!%p1558_p4) target bundleno = 376 (0x178), region = 98  ;;  %s1337_s11 = sshll.u32 (%p1558_p4), %s1546_s12, 3  ;;  %v1168_v58 = vld [vmem:[%s1667_s24] sm:$0xff] (%p1558_p4)  ;;  %v1170_v59 = vld [vmem:[%s1667_s24 + $0x8] sm:$0xff] (%p1558_p4) }
 0x174   : > { %s1137_s19 = scalar_lea.vmem (%p1558_p4), %s1710_s9, %s1337_s11 }
 0x175   : > { %1169 = vst [vmem:[%s1137_s19] sm:$0xff] (%p1558_p4), %v1168_v58  ;;  %1171 = vst [vmem:[%s1137_s19 + $0x18] sm:$0xff] (%p1558_p4), %v1170_v59 }
 0x178 PF: > { %p18_p7 = scmp.ge.s32.totalorder %s1548_s13, 5   ;;  %s1714_s30 = smov %s1472_s10 }
 0x179   : > { %s1715_s10 = smov %s1556_s16  ;;  %s1716_s11 = smov %s1548_s13 }
 0x17a   :  { %20 = sbr.rel (!%p18_p7) target bundleno = 2 (0x2), region = 186 }
 0x17f   :  { %1194 = vsyncpa [#allocation3], 1 }
 0x180   :  { %1196 = vsyncpa [#allocation3 + $0x1], 1 }

</bundles_post_ra>
